<compile_context>
chip_gen: v5e
topology: v5e:2x2
jax: 0.10.0
libtpu: 0.0.40
codegen_flags: <defaults>
</compile_context>

<pallas_src>
import jax
import jax.numpy as jnp
from jax.experimental import pallas as pl
from jax.experimental.pallas import tpu as pltpu


def prepare_conv_trans_weight(weight_t):
    """One-time weight prep (hoisted out of the forward path).

    weight_t: (C_in, C_out, kH, kW)  PyTorch ConvTranspose2d layout
    Returns:  (kH, kW, C_out, C_in)  spatially flipped + in/out swapped, so the
              kernel can apply it as a plain conv with effective padding k-1-p.
    """
    return jnp.flip(weight_t, axis=(2, 3)).transpose(2, 3, 1, 0)


def conv_trans_block(x_nchw, w_taps, padding=1):
    """Forward of Conv_Trans_Block (ConvTranspose2d(stride=1, bias=False) + ReLU).

    x_nchw: (N, C_in, H, W)           float32, NCHW (PyTorch convention)
    w_taps: (kH, kW, C_out, C_in)     from prepare_conv_trans_weight()
    Returns: (N, C_out, H_out, W_out) NCHW
    """
    N, C_in, H, W = x_nchw.shape
    kH, kW, C_out, C_in_w = w_taps.shape
    assert C_in_w == C_in, (C_in_w, C_in)

    eff_pad_h = kH - 1 - padding
    eff_pad_w = kW - 1 - padding
    H_out = H + kH - 1 - 2 * padding
    W_out = W + kW - 1 - 2 * padding
    if eff_pad_h < 0 or eff_pad_w < 0 or H_out != H or W_out != W:
        # TODO(synk): the roll-based im2col assumes kernel_size == 2*padding + 1
        # (spatial-size preserving — the module's standard k=3 / p=1 use); other
        # configurations would need a padded-scratch path.
        raise NotImplementedError(
            "conv_trans_block fast path requires kernel_size == 2*padding + 1")

    HW = H * W
    KK = kH * kW

    # Free reshapes (NCHW is contiguous): activation becomes lane-dense
    # (N, C_in, H*W); weight becomes (kH*kW, C_out, C_in) per-tap slabs.
    x_flat = x_nchw.reshape(N, C_in, HW)
    w_flat = w_taps.reshape(KK, C_out, C_in)

    # Batch blocking: as few grid steps as possible while keeping >= 2 steps
    # when N >= 2 (so both v7x TensorCores get work); v5e/v6e run the grid
    # serially and just amortize per-step overhead over fatter steps.
    itemsize = x_flat.dtype.itemsize
    per_elem_bytes = 2 * (C_in + C_out) * HW * itemsize   # double-buffered in+out
    cap = max(1, (8 * 1024 * 1024) // per_elem_bytes)     # stay well under VMEM
    target = min(N // 2, cap) if N >= 2 else 1
    b_blk = 1
    for d in range(max(target, 1), 0, -1):
        if N % d == 0:
            b_blk = d
            break
    num_steps = N // b_blk

    def kernel(x_ref, w_ref, o_ref):
        # x_ref: (b_blk, C_in, H*W)    lane-dense activations
        # w_ref: (kH*kW, C_out, C_in)  flipped ConvTranspose weight, per tap
        # o_ref: (b_blk, C_out, H*W)   lane-dense output
        lane = jax.lax.broadcasted_iota(jnp.int32, (C_in, HW), 1)
        if (W & (W - 1)) == 0:
            col = lane & (W - 1)        # ow = lane % W (power-of-two width)
        else:
            col = lane % W              # TODO(synk): vector rem for non-pow2 widths

        # Per-tap (weight slab, lane shift, validity mask).  Shift/mask depend
        # only on the tap, so build them once and reuse across the batch block.
        taps = []
        for kh in range(kH):
            dh = kh - eff_pad_h
            for kw in range(kW):
                dw = kw - eff_pad_w
                if -dh >= H or dh >= H or -dw >= W or dw >= W:
                    continue            # tap never overlaps the input
                cond = None
                if dh < 0:              # need oh + dh >= 0  <=>  lane >= -dh*W
                    cond = lane >= (-dh) * W
                elif dh > 0:            # need oh + dh < H   <=>  lane < (H-dh)*W
                    cond = lane < (H - dh) * W
                if dw < 0:              # need ow + dw >= 0
                    c = col >= -dw
                    cond = c if cond is None else cond & c
                elif dw > 0:            # need ow + dw < W
                    c = col < (W - dw)
                    cond = c if cond is None else cond & c
                shift = (-(dh * W + dw)) % HW
                taps.append((w_ref[kh * kW + kw], shift, cond))

        for b in range(b_blk):
            xb = x_ref[b]               # (C_in, HW), lane-dense
            acc = None
            for w_tap, shift, cond in taps:
                t = xb if shift == 0 else pltpu.roll(xb, shift=shift, axis=1)
                if cond is not None:
                    t = jnp.where(cond, t, 0.0)
                # (C_out, C_in) @ (C_in, HW) -> (C_out, HW); per-tap MXU dot
                # accumulated in registers (no col slab / scratch traffic).
                contrib = jnp.dot(w_tap, t, preferred_element_type=jnp.float32)
                acc = contrib if acc is None else acc + contrib
            o_ref[b] = jnp.maximum(acc, 0.0).astype(o_ref.dtype)   # fused ReLU

    out_flat = pl.pallas_call(
        kernel,
        out_shape=jax.ShapeDtypeStruct((N, C_out, HW), x_nchw.dtype),
        grid=(num_steps,),
        in_specs=[
            pl.BlockSpec((b_blk, C_in, HW), lambda i: (i, 0, 0)),
            pl.BlockSpec((KK, C_out, C_in), lambda i: (0, 0, 0)),
        ],
        out_specs=pl.BlockSpec((b_blk, C_out, HW), lambda i: (i, 0, 0)),
        compiler_params=pltpu.CompilerParams(
            dimension_semantics=("parallel",)),
    )(x_flat, w_flat)

    # Free reshape (no transpose / extra HBM pass) back to NCHW.
    return out_flat.reshape(N, C_out, H_out, W_out)


def _reference_conv_trans_block(x_nchw, weight_t, padding=1):
    """Naive plain-JAX ConvTranspose2d(stride=1) + ReLU for verification."""
    N, C_in, H, W = x_nchw.shape
    _, C_out, kH, kW = weight_t.shape
    H_out = H + kH - 1 - 2 * padding
    W_out = W + kW - 1 - 2 * padding
    y_full = jnp.zeros((N, C_out, H + kH - 1, W + kW - 1), x_nchw.dtype)
    for kh in range(kH):
        for kw in range(kW):
            contrib = jnp.einsum('nchw,co->nohw', x_nchw, weight_t[:, :, kh, kw])
            y_full = y_full.at[:, :, kh:kh + H, kw:kw + W].add(contrib)
    y = y_full[:, :, padding:padding + H_out, padding:padding + W_out]
    return jnp.maximum(y, 0.0)


if __name__ == "__main__":
    key = jax.random.PRNGKey(0)
    k_x, k_w = jax.random.split(key)

    # Small shapes consistent with the module: N=2, C_in=4, C_out=8, 16x16, k=3.
    N, C_in, C_out, H, W, K = 2, 4, 8, 16, 16, 3

    x = jax.random.normal(k_x, (N, C_in, H, W), dtype=jnp.float32)
    # PyTorch ConvTranspose2d weight layout: (in_channels, out_channels, kH, kW)
    weight_t = (jax.random.normal(k_w, (C_in, C_out, K, K), dtype=jnp.float32)
                * 0.1)

    # Weight prep hoisted out of the forward path (done once per module).
    w_taps = prepare_conv_trans_weight(weight_t)

    out = conv_trans_block(x, w_taps, padding=1)
    out = jax.block_until_ready(out)

    ref = _reference_conv_trans_block(x, weight_t, padding=1)
    assert out.shape == ref.shape, (out.shape, ref.shape)
    assert jnp.allclose(out, ref, atol=1e-4, rtol=1e-4), "mismatch vs reference"

    print("KERNEL_OK")
</pallas_src>

<mosaic_0001>
module attributes {stable_mosaic.version = 11 : i64} {
  func.func @kernel(%arg0: i32, %arg1: memref<1x4x256xf32, #tpu.memory_space<vmem>>, %arg2: memref<9x8x4xf32, #tpu.memory_space<vmem>>, %arg3: memref<1x8x256xf32, #tpu.memory_space<vmem>>) attributes {dimension_semantics = [#tpu.dimension_semantics<parallel>], iteration_bounds = array<i64: 2>, scalar_prefetch = 0 : i64, scratch_operands = 0 : i64, tpu.core_type = #tpu.core_type<tc>, window_params = [{transform_indices = @transform_0, window_bounds = array<i64: 1, 4, 256>}, {pipeline_mode = #tpu.pipeline_mode<synchronous>, transform_indices = @transform_1, window_bounds = array<i64: 9, 8, 4>}, {transform_indices = @transform_2, window_bounds = array<i64: 1, 8, 256>}]} {
    %0 = tpu.iota {dimensions = array<i32: 1>} : vector<4x256xi32>
    %c15_i32 = arith.constant 15 : i32
    %1 = vector.broadcast %c15_i32 : i32 to vector<4x256xi32>
    %2 = arith.andi %0, %1 : vector<4x256xi32>
    %c16_i32 = arith.constant 16 : i32
    %3 = vector.broadcast %c16_i32 : i32 to vector<4x256xi32>
    %4 = arith.cmpi sge, %0, %3 : vector<4x256xi32>
    %c1_i32 = arith.constant 1 : i32
    %5 = vector.broadcast %c1_i32 : i32 to vector<4x256xi32>
    %6 = arith.cmpi sge, %2, %5 : vector<4x256xi32>
    %7 = arith.andi %4, %6 : vector<4x256xi1>
    %c0 = arith.constant 0 : index
    %c0_0 = arith.constant 0 : index
    %c0_1 = arith.constant 0 : index
    %8 = vector.load %arg2[%c0, %c0_0, %c0_1] : memref<9x8x4xf32, #tpu.memory_space<vmem>>, vector<1x8x4xf32>
    %9 = vector.shape_cast %8 : vector<1x8x4xf32> to vector<8x4xf32>
    %c16_i32_2 = arith.constant 16 : i32
    %10 = vector.broadcast %c16_i32_2 : i32 to vector<4x256xi32>
    %11 = arith.cmpi sge, %0, %10 : vector<4x256xi32>
    %c1 = arith.constant 1 : index
    %c0_3 = arith.constant 0 : index
    %c0_4 = arith.constant 0 : index
    %12 = vector.load %arg2[%c1, %c0_3, %c0_4] : memref<9x8x4xf32, #tpu.memory_space<vmem>>, vector<1x8x4xf32>
    %13 = vector.shape_cast %12 : vector<1x8x4xf32> to vector<8x4xf32>
    %c16_i32_5 = arith.constant 16 : i32
    %14 = vector.broadcast %c16_i32_5 : i32 to vector<4x256xi32>
    %15 = arith.cmpi sge, %0, %14 : vector<4x256xi32>
    %c15_i32_6 = arith.constant 15 : i32
    %16 = vector.broadcast %c15_i32_6 : i32 to vector<4x256xi32>
    %17 = arith.cmpi slt, %2, %16 : vector<4x256xi32>
    %18 = arith.andi %15, %17 : vector<4x256xi1>
    %c2 = arith.constant 2 : index
    %c0_7 = arith.constant 0 : index
    %c0_8 = arith.constant 0 : index
    %19 = vector.load %arg2[%c2, %c0_7, %c0_8] : memref<9x8x4xf32, #tpu.memory_space<vmem>>, vector<1x8x4xf32>
    %20 = vector.shape_cast %19 : vector<1x8x4xf32> to vector<8x4xf32>
    %c1_i32_9 = arith.constant 1 : i32
    %21 = vector.broadcast %c1_i32_9 : i32 to vector<4x256xi32>
    %22 = arith.cmpi sge, %2, %21 : vector<4x256xi32>
    %c3 = arith.constant 3 : index
    %c0_10 = arith.constant 0 : index
    %c0_11 = arith.constant 0 : index
    %23 = vector.load %arg2[%c3, %c0_10, %c0_11] : memref<9x8x4xf32, #tpu.memory_space<vmem>>, vector<1x8x4xf32>
    %24 = vector.shape_cast %23 : vector<1x8x4xf32> to vector<8x4xf32>
    %c4 = arith.constant 4 : index
    %c0_12 = arith.constant 0 : index
    %c0_13 = arith.constant 0 : index
    %25 = vector.load %arg2[%c4, %c0_12, %c0_13] : memref<9x8x4xf32, #tpu.memory_space<vmem>>, vector<1x8x4xf32>
    %26 = vector.shape_cast %25 : vector<1x8x4xf32> to vector<8x4xf32>
    %c15_i32_14 = arith.constant 15 : i32
    %27 = vector.broadcast %c15_i32_14 : i32 to vector<4x256xi32>
    %28 = arith.cmpi slt, %2, %27 : vector<4x256xi32>
    %c5 = arith.constant 5 : index
    %c0_15 = arith.constant 0 : index
    %c0_16 = arith.constant 0 : index
    %29 = vector.load %arg2[%c5, %c0_15, %c0_16] : memref<9x8x4xf32, #tpu.memory_space<vmem>>, vector<1x8x4xf32>
    %30 = vector.shape_cast %29 : vector<1x8x4xf32> to vector<8x4xf32>
    %c240_i32 = arith.constant 240 : i32
    %31 = vector.broadcast %c240_i32 : i32 to vector<4x256xi32>
    %32 = arith.cmpi slt, %0, %31 : vector<4x256xi32>
    %c1_i32_17 = arith.constant 1 : i32
    %33 = vector.broadcast %c1_i32_17 : i32 to vector<4x256xi32>
    %34 = arith.cmpi sge, %2, %33 : vector<4x256xi32>
    %35 = arith.andi %32, %34 : vector<4x256xi1>
    %c6 = arith.constant 6 : index
    %c0_18 = arith.constant 0 : index
    %c0_19 = arith.constant 0 : index
    %36 = vector.load %arg2[%c6, %c0_18, %c0_19] : memref<9x8x4xf32, #tpu.memory_space<vmem>>, vector<1x8x4xf32>
    %37 = vector.shape_cast %36 : vector<1x8x4xf32> to vector<8x4xf32>
    %c240_i32_20 = arith.constant 240 : i32
    %38 = vector.broadcast %c240_i32_20 : i32 to vector<4x256xi32>
    %39 = arith.cmpi slt, %0, %38 : vector<4x256xi32>
    %c7 = arith.constant 7 : index
    %c0_21 = arith.constant 0 : index
    %c0_22 = arith.constant 0 : index
    %40 = vector.load %arg2[%c7, %c0_21, %c0_22] : memref<9x8x4xf32, #tpu.memory_space<vmem>>, vector<1x8x4xf32>
    %41 = vector.shape_cast %40 : vector<1x8x4xf32> to vector<8x4xf32>
    %c240_i32_23 = arith.constant 240 : i32
    %42 = vector.broadcast %c240_i32_23 : i32 to vector<4x256xi32>
    %43 = arith.cmpi slt, %0, %42 : vector<4x256xi32>
    %c15_i32_24 = arith.constant 15 : i32
    %44 = vector.broadcast %c15_i32_24 : i32 to vector<4x256xi32>
    %45 = arith.cmpi slt, %2, %44 : vector<4x256xi32>
    %46 = arith.andi %43, %45 : vector<4x256xi1>
    %c8 = arith.constant 8 : index
    %c0_25 = arith.constant 0 : index
    %c0_26 = arith.constant 0 : index
    %47 = vector.load %arg2[%c8, %c0_25, %c0_26] : memref<9x8x4xf32, #tpu.memory_space<vmem>>, vector<1x8x4xf32>
    %48 = vector.shape_cast %47 : vector<1x8x4xf32> to vector<8x4xf32>
    %c0_27 = arith.constant 0 : index
    %c0_28 = arith.constant 0 : index
    %c0_29 = arith.constant 0 : index
    %49 = vector.load %arg1[%c0_27, %c0_28, %c0_29] : memref<1x4x256xf32, #tpu.memory_space<vmem>>, vector<1x4x256xf32>
    %50 = vector.shape_cast %49 : vector<1x4x256xf32> to vector<4x256xf32>
    %c17_i32 = arith.constant 17 : i32
    %51 = tpu.dynamic_rotate %50 by %c17_i32 dim 1 : vector<4x256xf32>, i32 -> vector<4x256xf32>
    %cst = arith.constant 0.000000e+00 : f32
    %52 = vector.broadcast %cst : f32 to vector<4x256xf32>
    %53 = arith.select %7, %51, %52 : vector<4x256xi1>, vector<4x256xf32>
    %cst_30 = arith.constant dense<0.000000e+00> : vector<8x256xf32>
    %54 = tpu.matmul %9, %53, %cst_30 {dimension_numbers = #tpu.dot_dimension_numbers<[1], [0], [0], [1], [0, 0, 1, 1], [], []>} : vector<8x4xf32>, vector<4x256xf32>, vector<8x256xf32> -> vector<8x256xf32>
    %c16_i32_31 = arith.constant 16 : i32
    %55 = tpu.dynamic_rotate %50 by %c16_i32_31 dim 1 : vector<4x256xf32>, i32 -> vector<4x256xf32>
    %cst_32 = arith.constant 0.000000e+00 : f32
    %56 = vector.broadcast %cst_32 : f32 to vector<4x256xf32>
    %57 = arith.select %11, %55, %56 : vector<4x256xi1>, vector<4x256xf32>
    %cst_33 = arith.constant dense<0.000000e+00> : vector<8x256xf32>
    %58 = tpu.matmul %13, %57, %cst_33 {dimension_numbers = #tpu.dot_dimension_numbers<[1], [0], [0], [1], [0, 0, 1, 1], [], []>} : vector<8x4xf32>, vector<4x256xf32>, vector<8x256xf32> -> vector<8x256xf32>
    %59 = arith.addf %54, %58 : vector<8x256xf32>
    %c15_i32_34 = arith.constant 15 : i32
    %60 = tpu.dynamic_rotate %50 by %c15_i32_34 dim 1 : vector<4x256xf32>, i32 -> vector<4x256xf32>
    %cst_35 = arith.constant 0.000000e+00 : f32
    %61 = vector.broadcast %cst_35 : f32 to vector<4x256xf32>
    %62 = arith.select %18, %60, %61 : vector<4x256xi1>, vector<4x256xf32>
    %cst_36 = arith.constant dense<0.000000e+00> : vector<8x256xf32>
    %63 = tpu.matmul %20, %62, %cst_36 {dimension_numbers = #tpu.dot_dimension_numbers<[1], [0], [0], [1], [0, 0, 1, 1], [], []>} : vector<8x4xf32>, vector<4x256xf32>, vector<8x256xf32> -> vector<8x256xf32>
    %64 = arith.addf %59, %63 : vector<8x256xf32>
    %c1_i32_37 = arith.constant 1 : i32
    %65 = tpu.dynamic_rotate %50 by %c1_i32_37 dim 1 : vector<4x256xf32>, i32 -> vector<4x256xf32>
    %cst_38 = arith.constant 0.000000e+00 : f32
    %66 = vector.broadcast %cst_38 : f32 to vector<4x256xf32>
    %67 = arith.select %22, %65, %66 : vector<4x256xi1>, vector<4x256xf32>
    %cst_39 = arith.constant dense<0.000000e+00> : vector<8x256xf32>
    %68 = tpu.matmul %24, %67, %cst_39 {dimension_numbers = #tpu.dot_dimension_numbers<[1], [0], [0], [1], [0, 0, 1, 1], [], []>} : vector<8x4xf32>, vector<4x256xf32>, vector<8x256xf32> -> vector<8x256xf32>
    %69 = arith.addf %64, %68 : vector<8x256xf32>
    %cst_40 = arith.constant dense<0.000000e+00> : vector<8x256xf32>
    %70 = tpu.matmul %26, %50, %cst_40 {dimension_numbers = #tpu.dot_dimension_numbers<[1], [0], [0], [1], [0, 0, 1, 1], [], []>} : vector<8x4xf32>, vector<4x256xf32>, vector<8x256xf32> -> vector<8x256xf32>
    %71 = arith.addf %69, %70 : vector<8x256xf32>
    %c255_i32 = arith.constant 255 : i32
    %72 = tpu.dynamic_rotate %50 by %c255_i32 dim 1 : vector<4x256xf32>, i32 -> vector<4x256xf32>
    %cst_41 = arith.constant 0.000000e+00 : f32
    %73 = vector.broadcast %cst_41 : f32 to vector<4x256xf32>
    %74 = arith.select %28, %72, %73 : vector<4x256xi1>, vector<4x256xf32>
    %cst_42 = arith.constant dense<0.000000e+00> : vector<8x256xf32>
    %75 = tpu.matmul %30, %74, %cst_42 {dimension_numbers = #tpu.dot_dimension_numbers<[1], [0], [0], [1], [0, 0, 1, 1], [], []>} : vector<8x4xf32>, vector<4x256xf32>, vector<8x256xf32> -> vector<8x256xf32>
    %76 = arith.addf %71, %75 : vector<8x256xf32>
    %c241_i32 = arith.constant 241 : i32
    %77 = tpu.dynamic_rotate %50 by %c241_i32 dim 1 : vector<4x256xf32>, i32 -> vector<4x256xf32>
    %cst_43 = arith.constant 0.000000e+00 : f32
    %78 = vector.broadcast %cst_43 : f32 to vector<4x256xf32>
    %79 = arith.select %35, %77, %78 : vector<4x256xi1>, vector<4x256xf32>
    %cst_44 = arith.constant dense<0.000000e+00> : vector<8x256xf32>
    %80 = tpu.matmul %37, %79, %cst_44 {dimension_numbers = #tpu.dot_dimension_numbers<[1], [0], [0], [1], [0, 0, 1, 1], [], []>} : vector<8x4xf32>, vector<4x256xf32>, vector<8x256xf32> -> vector<8x256xf32>
    %81 = arith.addf %76, %80 : vector<8x256xf32>
    %c240_i32_45 = arith.constant 240 : i32
    %82 = tpu.dynamic_rotate %50 by %c240_i32_45 dim 1 : vector<4x256xf32>, i32 -> vector<4x256xf32>
    %cst_46 = arith.constant 0.000000e+00 : f32
    %83 = vector.broadcast %cst_46 : f32 to vector<4x256xf32>
    %84 = arith.select %39, %82, %83 : vector<4x256xi1>, vector<4x256xf32>
    %cst_47 = arith.constant dense<0.000000e+00> : vector<8x256xf32>
    %85 = tpu.matmul %41, %84, %cst_47 {dimension_numbers = #tpu.dot_dimension_numbers<[1], [0], [0], [1], [0, 0, 1, 1], [], []>} : vector<8x4xf32>, vector<4x256xf32>, vector<8x256xf32> -> vector<8x256xf32>
    %86 = arith.addf %81, %85 : vector<8x256xf32>
    %c239_i32 = arith.constant 239 : i32
    %87 = tpu.dynamic_rotate %50 by %c239_i32 dim 1 : vector<4x256xf32>, i32 -> vector<4x256xf32>
    %cst_48 = arith.constant 0.000000e+00 : f32
    %88 = vector.broadcast %cst_48 : f32 to vector<4x256xf32>
    %89 = arith.select %46, %87, %88 : vector<4x256xi1>, vector<4x256xf32>
    %cst_49 = arith.constant dense<0.000000e+00> : vector<8x256xf32>
    %90 = tpu.matmul %48, %89, %cst_49 {dimension_numbers = #tpu.dot_dimension_numbers<[1], [0], [0], [1], [0, 0, 1, 1], [], []>} : vector<8x4xf32>, vector<4x256xf32>, vector<8x256xf32> -> vector<8x256xf32>
    %91 = arith.addf %86, %90 : vector<8x256xf32>
    %cst_50 = arith.constant 0.000000e+00 : f32
    %92 = vector.broadcast %cst_50 : f32 to vector<8x256xf32>
    %93 = arith.maximumf %91, %92 : vector<8x256xf32>
    %c0_51 = arith.constant 0 : index
    %c0_52 = arith.constant 0 : index
    %c0_53 = arith.constant 0 : index
    %94 = vector.load %arg3[%c0_51, %c0_52, %c0_53] : memref<1x8x256xf32, #tpu.memory_space<vmem>>, vector<1x8x256xf32>
    %95 = vector.shape_cast %94 : vector<1x8x256xf32> to vector<8x256xf32>
    %96 = vector.shape_cast %93 : vector<8x256xf32> to vector<1x8x256xf32>
    tpu.vector_store %arg3[%c0_51, %c0_52, %c0_53], %96 {strides = array<i32>} : memref<1x8x256xf32, #tpu.memory_space<vmem>>, vector<1x8x256xf32>,
    return
  }
  func.func @transform_0(%arg0: i32) -> (i32, i32, i32) {
    %c0_i32 = arith.constant 0 : i32
    %c0_i32_0 = arith.constant 0 : i32
    %c0_i32_1 = arith.constant 0 : i32
    return %arg0, %c0_i32, %c0_i32_0 : i32, i32, i32
  }
  func.func @transform_1(%arg0: i32) -> (i32, i32, i32) {
    %c0_i32 = arith.constant 0 : i32
    %c0_i32_0 = arith.constant 0 : i32
    %c0_i32_1 = arith.constant 0 : i32
    %c0_i32_2 = arith.constant 0 : i32
    return %c0_i32, %c0_i32_0, %c0_i32_1 : i32, i32, i32
  }
  func.func @transform_2(%arg0: i32) -> (i32, i32, i32) {
    %c0_i32 = arith.constant 0 : i32
    %c0_i32_0 = arith.constant 0 : i32
    %c0_i32_1 = arith.constant 0 : i32
    return %arg0, %c0_i32, %c0_i32_0 : i32, i32, i32
  }
}

</mosaic_0001>

<bundles_post_ra>
// kernel: tpu_custom_call.1
= control target key start
LH: loop header
LB: loop body
LE: loop exit
PB: predicated region body
PF: predicated region fallthrough
CT: control target
= control target key end

     0   :  { %7 = vsyncpa [#allocation3], 0  ;;  %s1247_s0 = inlined_call_operand.vmem [shape: f32[2,4,256], index: 0, kind: input, shape index: {}]   ;;  %s1248_s1 = inlined_call_operand.vmem [shape: f32[9,8,4], index: 1, kind: input, shape index: {}]   ;;  %s1249_s2 = inlined_call_operand.hbm [shape: f32[2,8,256], index: 2, kind: output, shape index: {}]  }
   0x1   :  { %9 = vsyncpa [#allocation3 + $0x1], 0  ;;  %s1024_s9 = smov 0   ;;  %s1026_s10 = smov 0  }
   0x2   :  { %s1028_s11 = smov 0   ;;  %s1030_s12 = smov 0  }
   0x3 LB: > { %s1045_s13 = sadd.s32 4294967295, %s999_s12   ;;  %s832_s14 = sadd.s32 4294967294, %s999_s12   ;;  %s999_s12 = sphi %s1030_s12, %s1263_s12   ;;  %s995_s11 = sphi %s1028_s11, %s1262_s11   ;;  %s991_s10 = sphi %s1026_s10, %s1261_s10   ;;  %s987_s9 = sphi %s1024_s9, %s1260_s9  }
   0x4   : > { %s1049_s15 = sadd.s32 1, %s999_s12   ;;  %s69_s16 = sadd.s32 1, %s995_s11 }
   0x5   : > { %s66_s17 = ssub.s32 %s999_s12, %s1049_s15  ;;  %p79_p0 = scmp.ne.s32.totalorder %s995_s11, %s991_s10 }
   0x6   : > { %p67_p1 = scmp.eq.s32.totalorder %s66_s17, 0  ;;  %p80_p2 = scmp.eq.s32.totalorder %s1045_s13, 1 }
   0x7   : > { %p85_p3 = scmp.ne.s32.totalorder %s991_s10, %s987_s9  ;;  %p86_p4 = scmp.eq.s32.totalorder %s832_s14, 1 }
   0x8   : > { %s1060_s18 = scalar_select %p67_p1, %s995_s11, %s69_s16  }
   0x9   : > { %p1062_p5 = por %p80_p2, %p79_p0  ;;  %p1066_p6 = por %p86_p4, %p85_p3 }
   0xa   : > { %p835_p7 = scmp.ge.s32.totalorder %s999_s12, 1  ;;  %p115_p8 = scmp.lt.s32.totalorder %s999_s12, 3 }
   0xc   : > { %p116_p9 = pnand %p835_p7, %p115_p8 }
   0xd   : > { %p137_p10 = scmp.lt.s32.totalorder (!%p116_p9), %s1045_s13, 1  ;;  %s1001_s26 = smov (!%p116_p9), 17  }
   0xe   : > { %119 = sbr.rel (%p116_p9) target bundleno = 348 (0x15c), region = 28  ;;  %s1002_s27 = smov (!%p116_p9), 16  }
   0xf   : > { %s1003_s28 = smov (!%p116_p9), 15   ;;  %s1004_s29 = smov (!%p116_p9), 1  }
  0x10   : > { %s1005_s30 = smov (!%p116_p9), 127   ;;  %s1006_s3 = smov (!%p116_p9), 113  }
  0x11   : > { %s1007_s4 = smov (!%p116_p9), 112   ;;  %s1008_s5 = smov (!%p116_p9), 111  }
  0x12   : > { %s889_s7 = sshll.u32 (!%p116_p9), %s1045_s13, 4 }
  0x13   : > { %s138_s21 = scalar_select %p137_p10, %s1045_s13, 1  ;;  %v142_v19 = vlaneseq  ;;  %vm214_vm5 = vcmask 1043456   ;;  %vm210_vm6 = vcmask 31744   ;;  %v153_v32 = vld [vmem:[%s1248_s1] sm:$0xff]  ;;  %v839_v41 = vld [vmem:[%s1248_s1 + $0x8] sm:$0xff]  ;;  %v840_v51 = vld [vmem:[%s1248_s1 + $0x10] sm:$0xff] }
  0x14   : > { %v841_v54 = vld [vmem:[%s1248_s1 + $0x18] sm:$0xff]  ;;  %v842_v55 = vld [vmem:[%s1248_s1 + $0x20] sm:$0xff]  ;;  %v843_v60 = vld [vmem:[%s1248_s1 + $0x28] sm:$0xff]  ;;  %s768_s16 = scalar_lea.hbm %s1249_s2, %s889_s7 }
  0x15   : > { %s888_s22 = sshll.u32 %s138_s21, 3  ;;  %v1081_v20 = vand.u32 127, %v142_v19 }
  0x16   : > { %s141_s25 = scalar_lea.vmem %s1247_s0, %s888_s22  ;;  %s772_s22 = sshll.u32 %s768_s16, 4  ;;  %s773_s22 = int_to_ptr.hbm [resolvable:$true] %s772_s22 }
  0x17   : > { %v180_v0 = vld [vmem:[%s141_s25] sm:$0xff]  ;;  %v1084_v21 = vadd.s32 128, %v1081_v20  ;;  %v145_v23 = vand.u32 15, %v1081_v20  ;;  %vm147_vm0 = vcmp.ge.s32.totalorder %v1081_v20, 16  ;;  %vm191_vm2 = vcmp.lt.s32.totalorder %v1081_v20, 17  ;;  %s951_s23 = sshra.s32 %s773_s22, 4  ;;  %s952_s23 = int_to_ptr.hbm [resolvable:$true] %s951_s23 }
  0x18   : > { %182 = vst [vmem:[#allocation1] ss:$2 sm:$0xff] %v180_v0  ;;  %vm319_vm7 = vcmp.lt.s32.totalorder %v1081_v20, 15  ;;  %vm205_vm9 = vcmp.lt.s32.totalorder %v1081_v20, 16  ;;  %vm384_vm12 = vcmp.lt.s32.totalorder %v1081_v20, 1  ;;  %vm501_vm13 = vcmp.lt.s32.totalorder %v1081_v20, 127  ;;  %p958_p0 = scmp.lt.s32.totalorder %s952_s23, %s1249_s2 }
  0x19   : > { %v146_v25 = vand.u32 15, %v1084_v21  ;;  %vm1089_vm1 = vcmp.ge.s32.totalorder %v145_v23, 1  ;;  %vm1112_vm8 = vcmp.lt.s32.totalorder %v145_v23, 15  ;;  %vm169_vm14 = vcmp.lt.s32.totalorder %v1084_v21, 240  ;;  %s953_s24 = scalar_lea.hbm %s952_s23, 16 }
  0x1a   : > { %vm151_vm3 = vmand %vm147_vm0, %vm1089_vm1  ;;  %vm566_vm15 = vcmp.lt.s32.totalorder %v1081_v20, 113  ;;  %p954_p11 = scmp.ne.s32.totalorder %s952_s23, %s953_s24 }
  0x1b   : > { %vm1098_vm4 = vcmp.ge.s32.totalorder %v146_v25, 1  ;;  %vm1117_vm10 = vcmp.lt.s32.totalorder %v146_v25, 15  ;;  %vm158_vm11 = vmand %vm147_vm0, %vm1112_vm8 }
  0x1c   : > { %p955_p12 = pnand %p954_p11, %p1062_p5 }
  0x1e   : > { %p956_p13 = pneg %p955_p12 }
  0x1f   : > { %v183_v1 = vld.sshfl [vmem:[#allocation1] sm:$0xff pattern:$0x75316420]  ;;  %v184_v2 = vld.sshfl [vmem:[#allocation1 + $0x8] sm:$0xff pattern:$0x75316420] }
  0x20   : > { %187 = vrot.lane.b32.xlu0 %v183_v1, %s1001_s26  ;;  %196 = vst [vmem:[#allocation1] ss:$2 sm:$0xff] %v180_v0 }
  0x27   : > { %v197_v3 = vld.sshfl [vmem:[#allocation1] sm:$0xff pattern:$0x75316420]  ;;  %v198_v4 = vld.sshfl [vmem:[#allocation1 + $0x8] sm:$0xff pattern:$0x75316420] }
  0x28   : > { %201 = vrot.lane.b32.xlu1 %v197_v3, %s1002_s27  ;;  %189 = vrot.lane.b32.xlu0 %v184_v2, %s1001_s26  ;;  %310 = vst [vmem:[#allocation1] ss:$2 sm:$0xff] %v180_v0  ;;  %v844_v3 = vld [vmem:[%s1248_s1 + $0x30] sm:$0xff] }
  0x2f   : > { %v311_v5 = vld.sshfl [vmem:[#allocation1] sm:$0xff pattern:$0x75316420]  ;;  %v312_v6 = vld.sshfl [vmem:[#allocation1 + $0x8] sm:$0xff pattern:$0x75316420] }
  0x30   : > { %203 = vrot.lane.b32.xlu1 %v198_v4, %s1002_s27  ;;  %375 = vst [vmem:[#allocation1] ss:$2 sm:$0xff] %v180_v0  ;;  %315 = vrot.lane.b32.xlu2 %v311_v5, %s1003_s28  ;;  %s957_s27 = scalar_lea.hbm %s1249_s2, 32 }
  0x31   : > { %p959_p1 = scmp.lt.s32.totalorder %s957_s27, %s953_s24 }
  0x33   : > { %p960_p2 = por %p959_p1, %p958_p0 }
  0x35   : > { %p961_p3 = pnand %p960_p2, %p956_p13 }
  0x37   : > { %v377_v7 = vld.sshfl [vmem:[#allocation1 + $0x8] sm:$0xff pattern:$0x75316420]  ;;  %v376_v8 = vld.sshfl [vmem:[#allocation1] sm:$0xff pattern:$0x75316420] }
  0x38   : > { %382 = vrot.lane.b32.xlu1 %v377_v7, %s1004_s29  ;;  %380 = vrot.lane.b32.xlu0 %v376_v8, %s1004_s29  ;;  %440 = vst [vmem:[#allocation1] ss:$2 sm:$0xff] %v180_v0  ;;  %v845_v8 = vld [vmem:[%s1248_s1 + $0x38] sm:$0xff] }
  0x39   : > { %317 = vrot.lane.b32.xlu2 %v312_v6, %s1003_s28 }
  0x3f   : > { %v1077_v9 = vld.sshfl [vmem:[#allocation1] sm:$0xff pattern:$0x75316420]  ;;  %v1079_v10 = vld.sshfl [vmem:[#allocation1 + $0x8] sm:$0xff pattern:$0x75316420] }
  0x40   : > { %492 = vst [vmem:[#allocation1] ss:$2 sm:$0xff] %v180_v0 }
  0x47   : > { %v494_v11 = vld.sshfl [vmem:[#allocation1 + $0x8] sm:$0xff pattern:$0x75316420]  ;;  %v493_v12 = vld.sshfl [vmem:[#allocation1] sm:$0xff pattern:$0x75316420] }
  0x48   : > { %499 = vrot.lane.b32.xlu0 %v494_v11, %s1005_s30  ;;  %557 = vst [vmem:[#allocation1] ss:$2 sm:$0xff] %v180_v0  ;;  %497 = vrot.lane.b32.xlu2 %v493_v12, %s1005_s30 }
  0x4f   : > { %v558_v13 = vld.sshfl [vmem:[#allocation1] sm:$0xff pattern:$0x75316420]  ;;  %v559_v14 = vld.sshfl [vmem:[#allocation1 + $0x8] sm:$0xff pattern:$0x75316420] }
  0x50   : > { %562 = vrot.lane.b32.xlu1 %v558_v13, %s1006_s3  ;;  %622 = vst [vmem:[#allocation1] ss:$2 sm:$0xff] %v180_v0  ;;  %564 = vrot.lane.b32.xlu2 %v559_v14, %s1006_s3 }
  0x57   : > { %v624_v15 = vld.sshfl [vmem:[#allocation1 + $0x8] sm:$0xff pattern:$0x75316420]  ;;  %v623_v16 = vld.sshfl [vmem:[#allocation1] sm:$0xff pattern:$0x75316420] }
  0x58   : > { %629 = vrot.lane.b32.xlu1 %v624_v15, %s1007_s4  ;;  %627 = vrot.lane.b32.xlu0 %v623_v16, %s1007_s4  ;;  %687 = vst [vmem:[#allocation1] ss:$2 sm:$0xff] %v180_v0  ;;  %v846_v16 = vld [vmem:[%s1248_s1 + $0x40] sm:$0xff] }
  0x5f   : > { %v689_v17 = vld.sshfl [vmem:[#allocation1 + $0x8] sm:$0xff pattern:$0x75316420]  ;;  %v688_v18 = vld.sshfl [vmem:[#allocation1] sm:$0xff pattern:$0x75316420] }
  0x60   : > { %694 = vrot.lane.b32.xlu0 %v689_v17, %s1008_s5  ;;  %692 = vrot.lane.b32.xlu2 %v688_v18, %s1008_s5  ;;  %s134_s5 = sand.u32 1, %s991_s10  }
  0x61   : > { %s836_s6 = sshll.u32 %s134_s5, 4  ;;  %s757_s13 = scalar_lea.sflag [#allocation3], %s134_s5 }
  0x62   : > { %s136_s17 = scalar_lea.vmem [#allocation2], %s836_s6 }
  0x63   : > { %s770_s21 = sshll.u32 %s136_s17, 4  ;;  %s771_s21 = int_to_ptr.vmem [resolvable:$true] %s770_s21 }
  0x8a   : > { %v316_v24 = vpop.permute.xlu2 %315 }
  0x92   : > { %v188_v22 = vpop.permute.xlu0 %187 }
  0x93   : > { %v318_v35 = vpop.permute.xlu2 %317 }
  0x94   : > { %v320_v37 = vsel %vm319_vm7, %v316_v24, %v318_v35  ;;  %v321_v39 = vsel %vm319_vm7, %v318_v35, %v316_v24 }
  0x95   : > { %v323_v44 = vsel %vm1117_vm10, %v320_v37, 0.0  ;;  %v322_v46 = vsel %vm158_vm11, %v321_v39, 0.0 }
  0x9a   : > { %v202_v28 = vpop.permute.xlu1 %201  ;;  %v190_v29 = vpop.permute.xlu0 %189 }
  0x9b   : > { %v193_v30 = vsel %vm191_vm2, %v190_v29, %v188_v22  ;;  %v192_v31 = vsel %vm191_vm2, %v188_v22, %v190_v29  ;;  %vm631_vm2 = vcmp.lt.s32.totalorder %v1081_v20, 112 }
  0x9c   : > { %v194_v33 = vsel %vm151_vm3, %v193_v30, 0.0  ;;  %v195_v34 = vsel %vm1098_vm4, %v192_v31, 0.0  ;;  %vm177_vm3 = vmand %vm169_vm14, %vm1117_vm10 }
  0x9d   : > { %851 = vmatpush.msk.msra.mxu2 %vm214_vm5, %v194_v33  ;;  %853 = vmatpush.msk.msra.mxu3 %vm214_vm5, %v195_v34 }
  0x9e   : > { %852 = vmatmul.msk.f32.vlgmr.msra.gmra.mxu2 %vm210_vm6, %v153_v32  ;;  %854 = vmatmul.msk.f32.vlgmr.msra.gmra.mxu3 %vm210_vm6, %v153_v32 }
  0xa2   : > { %v204_v40 = vpop.permute.xlu1 %203  ;;  %v498_v56 = vpop.permute.xlu2 %497 }
  0xa3   : > { %v206_v42 = vsel %vm205_vm9, %v202_v28, %v204_v40  ;;  %v207_v43 = vsel %vm205_vm9, %v204_v40, %v202_v28 }
  0xa4   : > { %849 = vmatpush.msk.msra.mxu1 %vm214_vm5, %v206_v42  ;;  %v208_v45 = vsel %vm147_vm0, %v207_v43, 0.0  ;;  %vm171_vm0 = vmand %vm169_vm14, %vm1098_vm4 }
  0xa5   : > { %847 = vmatpush.msk.msra.mxu0 %vm214_vm5, %v208_v45  ;;  %850 = vmatmul.msk.f32.vlgmr.msra.gmra.mxu1 %vm210_vm6, %v839_v41 }
  0xa6   : > { %848 = vmatmul.msk.f32.vlgmr.msra.gmra.mxu0 %vm210_vm6, %v839_v41  ;;  %857 = vmatpush.msk.msrb.mxu1 %vm214_vm5, %v323_v44 }
  0xa7   : > { %855 = vmatpush.msk.msrb.mxu0 %vm214_vm5, %v322_v46 }
  0xa8   : > { %865 = vmatpush.msk.msra.mxu1 %vm214_vm5, %v1079_v10 }
  0xa9   : > { %863 = vmatpush.msk.msra.mxu0 %vm214_vm5, %v1077_v9 }
  0xaa   : > { %v383_v47 = vpop.permute.xlu1 %382  ;;  %v381_v48 = vpop.permute.xlu0 %380 }
  0xab   : > { %v385_v49 = vsel %vm384_vm12, %v381_v48, %v383_v47  ;;  %v386_v50 = vsel %vm384_vm12, %v383_v47, %v381_v48  ;;  %v565_v63 = vpop.permute.xlu2 %564 }
  0xac   : > { %v387_v52 = vsel %vm1089_vm1, %v386_v50, 0.0  ;;  %v388_v53 = vsel %vm1098_vm4, %v385_v49, 0.0 }
  0xad   : > { %859 = vmatpush.msk.msrb.mxu2 %vm214_vm5, %v387_v52  ;;  %861 = vmatpush.msk.msrb.mxu3 %vm214_vm5, %v388_v53 }
  0xae   : > { %856 = vmatmul.msk.f32.vlgmr.msrb.gmra.mxu0 %vm210_vm6, %v840_v51  ;;  %858 = vmatmul.msk.f32.vlgmr.msrb.gmra.mxu1 %vm210_vm6, %v840_v51 }
  0xaf   : > { %860 = vmatmul.msk.f32.vlgmr.msrb.gmra.mxu2 %vm210_vm6, %v841_v54  ;;  %862 = vmatmul.msk.f32.vlgmr.msrb.gmra.mxu3 %vm210_vm6, %v841_v54 }
  0xb6   : > { %864 = vmatmul.msk.f32.vlgmr.msra.gmra.mxu0 %vm210_vm6, %v842_v55  ;;  %866 = vmatmul.msk.f32.vlgmr.msra.gmra.mxu1 %vm210_vm6, %v842_v55 }
  0xba   : > { %v500_v57 = vpop.permute.xlu0 %499  ;;  %v693_v12 = vpop.permute.xlu2 %692 }
  0xbb   : > { %v502_v58 = vsel %vm501_vm13, %v498_v56, %v500_v57  ;;  %v503_v59 = vsel %vm501_vm13, %v500_v57, %v498_v56 }
  0xbc   : > { %v504_v61 = vsel %vm1112_vm8, %v502_v58, 0.0  ;;  %v505_v62 = vsel %vm1117_vm10, %v503_v59, 0.0 }
  0xbd   : > { %867 = vmatpush.msk.msra.mxu2 %vm214_vm5, %v504_v61  ;;  %869 = vmatpush.msk.msra.mxu3 %vm214_vm5, %v505_v62 }
  0xbe   : > { %868 = vmatmul.msk.f32.vlgmr.msra.gmra.mxu2 %vm210_vm6, %v843_v60  ;;  %870 = vmatmul.msk.f32.vlgmr.msra.gmra.mxu3 %vm210_vm6, %v843_v60 }
  0xc2   : > { %v563_v0 = vpop.permute.xlu1 %562 }
  0xc3   : > { %v567_v1 = vsel %vm566_vm15, %v563_v0, %v565_v63  ;;  %v568_v2 = vsel %vm566_vm15, %v565_v63, %v563_v0 }
  0xc4   : > { %v569_v4 = vsel %vm1089_vm1, %v567_v1, 0.0  ;;  %v570_v5 = vsel %vm171_vm0, %v568_v2, 0.0  ;;  %vm696_vm1 = vcmp.lt.s32.totalorder %v1081_v20, 111 }
  0xc5   : > { %871 = vmatpush.msk.msrb.mxu0 %vm214_vm5, %v569_v4  ;;  %873 = vmatpush.msk.msrb.mxu1 %vm214_vm5, %v570_v5 }
  0xc6   : > { %872 = vmatmul.msk.f32.vlgmr.msrb.gmra.mxu0 %vm210_vm6, %v844_v3  ;;  %874 = vmatmul.msk.f32.vlgmr.msrb.gmra.mxu1 %vm210_vm6, %v844_v3 }
  0xca   : > { %v630_v6 = vpop.permute.xlu1 %629  ;;  %v628_v7 = vpop.permute.xlu0 %627 }
  0xcb   : > { %v632_v9 = vsel %vm631_vm2, %v628_v7, %v630_v6  ;;  %v633_v10 = vsel %vm631_vm2, %v630_v6, %v628_v7 }
  0xcc   : > { %v635_v11 = vsel %vm169_vm14, %v633_v10, 0.0  ;;  %875 = vmatpush.msk.msrb.mxu2 %vm214_vm5, %v632_v9 }
  0xcd   : > { %876 = vmatmul.msk.f32.vlgmr.msrb.gmra.mxu2 %vm210_vm6, %v845_v8  ;;  %877 = vmatpush.msk.msrb.mxu3 %vm214_vm5, %v635_v11 }
  0xce   : > { %878 = vmatmul.msk.f32.vlgmr.msrb.gmra.mxu3 %vm210_vm6, %v845_v8 }
  0xd2   : > { %v695_v13 = vpop.permute.xlu0 %694 }
  0xd3   : > { %v697_v14 = vsel %vm696_vm1, %v693_v12, %v695_v13  ;;  %v698_v15 = vsel %vm696_vm1, %v695_v13, %v693_v12 }
  0xd4   : > { %v699_v17 = vsel %vm1112_vm8, %v697_v14, 0.0  ;;  %v700_v18 = vsel %vm177_vm3, %v698_v15, 0.0 }
  0xd5   : > { %879 = vmatpush.msk.msra.mxu0 %vm214_vm5, %v699_v17  ;;  %881 = vmatpush.msk.msra.mxu1 %vm214_vm5, %v700_v18 }
  0xd6   : > { %880 = vmatmul.msk.f32.vlgmr.msra.gmra.mxu0 %vm210_vm6, %v846_v16  ;;  %882 = vmatmul.msk.f32.vlgmr.msra.gmra.mxu1 %vm210_vm6, %v846_v16 }
 0x121   : > { %v287_v21 = vpop.f32.mrf.mxu2  ;;  %v307_v22 = vpop.f32.mrf.mxu3 }
 0x122   : > { %v258_v20 = vpop.f32.mrf.mxu1 }
 0x123   : > { %v238_v19 = vpop.f32.mrf.mxu0  ;;  %v308_v26 = vadd.f32 %v307_v22, %v258_v20 }
 0x124   : > { %v288_v25 = vadd.f32 %v287_v21, %v238_v19 }
 0x12b   : > { %v350_v23 = vpop.f32.mrf.mxu0  ;;  %v370_v24 = vpop.f32.mrf.mxu1 }
 0x12c   : > { %v373_v28 = vadd.f32 %v350_v23, %v288_v25  ;;  %v374_v30 = vadd.f32 %v370_v24, %v308_v26 }
 0x132   : > { %v415_v27 = vpop.f32.mrf.mxu2  ;;  %v435_v29 = vpop.f32.mrf.mxu3 }
 0x133   : > { %v467_v31 = vpop.f32.mrf.mxu0  ;;  %v487_v32 = vpop.f32.mrf.mxu1  ;;  %v438_v33 = vadd.f32 %v415_v27, %v373_v28  ;;  %v439_v34 = vadd.f32 %v435_v29, %v374_v30 }
 0x135   : > { %v490_v36 = vadd.f32 %v467_v31, %v438_v33  ;;  %v491_v38 = vadd.f32 %v487_v32, %v439_v34 }
 0x141   : > { %v532_v35 = vpop.f32.mrf.mxu2  ;;  %v552_v37 = vpop.f32.mrf.mxu3 }
 0x142   : > { %v555_v39 = vadd.f32 %v532_v35, %v490_v36  ;;  %v556_v42 = vadd.f32 %v552_v37, %v491_v38 }
 0x143   : > { %v597_v40 = vpop.f32.mrf.mxu0  ;;  %v617_v41 = vpop.f32.mrf.mxu1 }
 0x144   : > { %v620_v43 = vadd.f32 %v597_v40, %v555_v39  ;;  %v621_v44 = vadd.f32 %v617_v41, %v556_v42 }
 0x150   : > { %v662_v45 = vpop.f32.mrf.mxu2 }
 0x151   : > { %v685_v46 = vadd.f32 %v662_v45, %v620_v43  ;;  %v682_v47 = vpop.f32.mrf.mxu3 }
 0x152   : > { %v686_v48 = vadd.f32 %v682_v47, %v621_v44 }
 0x153   : > { %v727_v49 = vpop.f32.mrf.mxu0  ;;  %v747_v50 = vpop.f32.mrf.mxu1 }
 0x154   : > { %v750_v51 = vadd.f32 %v727_v49, %v685_v46  ;;  %v751_v52 = vadd.f32 %v747_v50, %v686_v48 }
 0x156   : > { %v752_v53 = vmax.f32 %v750_v51, 0.0  ;;  %v753_v54 = vmax.f32 %v751_v52, 0.0 }
 0x158   : > { %754 = vst [vmem:[%s136_s17] sm:$0xff] %v752_v53 }
 0x159   : > { %755 = vst [vmem:[%s136_s17 + $0x8] sm:$0xff] %v753_v54 }
 0x15a   : > { %964 = shalt.err (!%p961_p3)
}
 0x15b   : > { %890 = dma.vmem_to_hbm [thread:$0]  (%p1062_p5), %s771_s21, 256, %s773_s22, %s757_s13  }
 0x15c PF: > { %p896_p4 = scmp.ge.s32.totalorder %s999_s12, 2  ;;  %s784_s30 = sand.u32 1, %s987_s9  }
 0x15d   : > { %s785_s3 = scalar_lea.sflag [#allocation3], %s784_s30 }
 0x15e   : > { %p893_p7 = pnand %p896_p4, %p1066_p6 }
 0x160   : > { %p894_p8 = pneg %p893_p7 }
 0x162   : > { %982 = dma.done.wait (%p894_p8), %s785_s3, 256  }
 0x163   : > { %984 = vsyncadd (%p894_p8), %s785_s3, 4294967040  ;;  %p12_p9 = scmp.ge.s32.totalorder %s1049_s15, 4   ;;  %s1260_s9 = smov %s991_s10 }
 0x164   : > { %s1261_s10 = smov %s995_s11  ;;  %s1262_s11 = smov %s1060_s18 }
 0x165   : > { %s1263_s12 = smov %s1049_s15  ;;  %14 = sbr.rel (!%p12_p9) target bundleno = 3 (0x3), region = 71 }
 0x16a   :  { %791 = vsyncpa [#allocation3], 1 }
 0x16b   :  { %793 = vsyncpa [#allocation3 + $0x1], 1 }

</bundles_post_ra>
